<compile_context>
chip_gen: v7x
topology: tpu7x:2x2x1
jax: 0.10.0
libtpu: 0.0.40
codegen_flags: <defaults>
</compile_context>

<pallas_src>
import jax
import jax.numpy as jnp
from jax import lax
from jax.experimental import pallas as pl
from jax.experimental.pallas import tpu as pltpu

_EPS = 1e-10


def _js_kernel(p_ref, q_ref, o_ref):
    # Cast once per block to f32 (keeps all transcendentals in f32 — important
    # on v5e where VPU/EUP have no bf16 path).
    p = p_ref[...].astype(jnp.float32)
    q = q_ref[...].astype(jnp.float32)

    pq = p + q
    m = pq * 0.5
    # 0.5*[KL(p||m) + KL(q||m)] summand, with a single shared log(m) and no
    # divisions:  p*log(p+eps) + q*log(q+eps) - (p+q)*log(m+eps)
    t = (p * jnp.log(p + _EPS)
         + q * jnp.log(q + _EPS)
         - pq * jnp.log(m + _EPS))

    # Reduce over the class (lane) axis via the idle MXU: ones(1,C) . t^T
    # -> lane-dense (1, batch_tile) result (avoids masked (tile,1) stores).
    ones = jnp.ones((1, t.shape[1]), jnp.float32)
    s = lax.dot_general(
        ones, t,
        dimension_numbers=(((1,), (1,)), ((), ())),
        preferred_element_type=jnp.float32,
    )
    o_ref[...] = (0.5 * s).astype(o_ref.dtype)


def _pick_batch_tile(B, C, itemsize):
    """Largest batch tile s.t. one input block is ~2 MiB (double-buffered x2
    inputs => ~8 MiB of VMEM), capped at 2048 rows and the (padded) batch."""
    target_block_bytes = 2 << 20
    rows = max(8, target_block_bytes // max(1, C * itemsize))
    if rows >= 128:
        rows = (rows // 128) * 128        # lane-dense output width
    else:
        rows = (rows // 8) * 8
    rows = min(rows, 2048)
    b_pad8 = ((B + 7) // 8) * 8
    rows = max(8, min(rows, b_pad8))
    return rows


def jensen_shannon(p, q, *, batch_tile=None):
    """p, q: (B, C) probability distributions. Returns (B,) JS divergence."""
    assert p.shape == q.shape and p.ndim == 2
    B, C = p.shape
    # TODO(synk): for vocab-scale C (>~256K classes) add a second grid axis
    # over C with a VMEM accumulator finalized via pl.when instead of loading
    # the whole row in one block.

    if batch_tile is None:
        batch_tile = _pick_batch_tile(B, C, jnp.dtype(p.dtype).itemsize)

    num_tiles = pl.cdiv(B, batch_tile)
    B_pad = num_tiles * batch_tile
    if B_pad != B:
        # Zero rows contribute exactly 0 and are sliced off below.
        pad = ((0, B_pad - B), (0, 0))
        p = jnp.pad(p, pad)
        q = jnp.pad(q, pad)

    # Explicit VMEM budget: 2 inputs x 2 pipeline buffers x block, plus slack.
    block_bytes = batch_tile * C * jnp.dtype(p.dtype).itemsize
    need = 4 * block_bytes + 4 * batch_tile * 4 + (1 << 20)
    vmem_limit = int(min(max(2 * need, 32 << 20), 48 << 20))  # v7x-safe (<64 MiB)

    out = pl.pallas_call(
        _js_kernel,
        out_shape=jax.ShapeDtypeStruct((num_tiles, batch_tile), jnp.float32),
        grid_spec=pl.GridSpec(
            grid=(num_tiles,),
            in_specs=[
                pl.BlockSpec((batch_tile, C), lambda i: (i, 0)),
                pl.BlockSpec((batch_tile, C), lambda i: (i, 0)),
            ],
            out_specs=pl.BlockSpec((1, batch_tile), lambda i: (i, 0)),
        ),
        compiler_params=pltpu.CompilerParams(
            dimension_semantics=("parallel",),
            vmem_limit_bytes=vmem_limit,
        ),
    )(p, q)
    return out.reshape(-1)[:B]


def _reference(p, q):
    # Pure-JAX reference mirroring the PyTorch forward exactly.
    m = (p + q) / 2.0
    kl = lambda a, b: jnp.sum(a * jnp.log((a + _EPS) / (b + _EPS)), axis=1)
    return 0.5 * kl(p, m) + 0.5 * kl(q, m)


if __name__ == "__main__":
    key = jax.random.PRNGKey(0)
    k1, k2 = jax.random.split(key)

    B, C = 8, 128  # batch, classes (small smoke-test shapes)
    # Probability distributions (softmax of random logits), as the module expects.
    p = jax.nn.softmax(jax.random.normal(k1, (B, C), dtype=jnp.float32), axis=1)
    q = jax.nn.softmax(jax.random.normal(k2, (B, C), dtype=jnp.float32), axis=1)

    js = jensen_shannon(p, q)
    jax.block_until_ready(js)

    ref = _reference(p, q)
    assert js.shape == (B,)
    assert jnp.allclose(js, ref, atol=1e-5, rtol=1e-5), (js, ref)

    print("KERNEL_OK")
</pallas_src>

<mosaic_0001>
module attributes {stable_mosaic.version = 11 : i64} {
  func.func @_js_kernel(%arg0: i32, %arg1: memref<8x128xf32, #tpu.memory_space<vmem>>, %arg2: memref<8x128xf32, #tpu.memory_space<vmem>>, %arg3: memref<1x8xf32, #tpu.memory_space<vmem>>) attributes {dimension_semantics = [#tpu.dimension_semantics<parallel>], iteration_bounds = array<i64: 1>, scalar_prefetch = 0 : i64, scratch_operands = 0 : i64, tpu.core_type = #tpu.core_type<tc>, window_params = [{transform_indices = @transform_0, window_bounds = array<i64: 8, 128>}, {transform_indices = @transform_1, window_bounds = array<i64: 8, 128>}, {transform_indices = @transform_2, window_bounds = array<i64: 1, 8>}]} {
    %c0 = arith.constant 0 : index
    %c0_0 = arith.constant 0 : index
    %0 = vector.load %arg1[%c0, %c0_0] : memref<8x128xf32, #tpu.memory_space<vmem>>, vector<8x128xf32>
    %c0_1 = arith.constant 0 : index
    %c0_2 = arith.constant 0 : index
    %1 = vector.load %arg2[%c0_1, %c0_2] : memref<8x128xf32, #tpu.memory_space<vmem>>, vector<8x128xf32>
    %2 = arith.addf %0, %1 : vector<8x128xf32>
    %cst = arith.constant 5.000000e-01 : f32
    %3 = vector.broadcast %cst : f32 to vector<8x128xf32>
    %4 = arith.mulf %2, %3 : vector<8x128xf32>
    %cst_3 = arith.constant 1.000000e-10 : f32
    %5 = vector.broadcast %cst_3 : f32 to vector<8x128xf32>
    %6 = arith.addf %0, %5 : vector<8x128xf32>
    %7 = math.log %6 : vector<8x128xf32>
    %8 = arith.mulf %0, %7 : vector<8x128xf32>
    %cst_4 = arith.constant 1.000000e-10 : f32
    %9 = vector.broadcast %cst_4 : f32 to vector<8x128xf32>
    %10 = arith.addf %1, %9 : vector<8x128xf32>
    %11 = math.log %10 : vector<8x128xf32>
    %12 = arith.mulf %1, %11 : vector<8x128xf32>
    %13 = arith.addf %8, %12 : vector<8x128xf32>
    %cst_5 = arith.constant 1.000000e-10 : f32
    %14 = vector.broadcast %cst_5 : f32 to vector<8x128xf32>
    %15 = arith.addf %4, %14 : vector<8x128xf32>
    %16 = math.log %15 : vector<8x128xf32>
    %17 = arith.mulf %2, %16 : vector<8x128xf32>
    %18 = arith.subf %13, %17 : vector<8x128xf32>
    %cst_6 = arith.constant 1.000000e+00 : f32
    %19 = vector.broadcast %cst_6 : f32 to vector<1x128xf32>
    %cst_7 = arith.constant dense<0.000000e+00> : vector<1x8xf32>
    %20 = tpu.matmul %19, %18, %cst_7 {dimension_numbers = #tpu.dot_dimension_numbers<[1], [1], [0], [0], [0, 0, 1, 0], [], []>} : vector<1x128xf32>, vector<8x128xf32>, vector<1x8xf32> -> vector<1x8xf32>
    %cst_8 = arith.constant 5.000000e-01 : f32
    %21 = vector.broadcast %cst_8 : f32 to vector<1x8xf32>
    %22 = arith.mulf %21, %20 : vector<1x8xf32>
    %c0_9 = arith.constant 0 : index
    %c0_10 = arith.constant 0 : index
    %23 = vector.load %arg3[%c0_9, %c0_10] : memref<1x8xf32, #tpu.memory_space<vmem>>, vector<1x8xf32>
    tpu.vector_store %arg3[%c0_9, %c0_10], %22 {strides = array<i32>} : memref<1x8xf32, #tpu.memory_space<vmem>>, vector<1x8xf32>,
    return
  }
  func.func @transform_0(%arg0: i32) -> (i32, i32) {
    %c0_i32 = arith.constant 0 : i32
    %c0_i32_0 = arith.constant 0 : i32
    return %arg0, %c0_i32 : i32, i32
  }
  func.func @transform_1(%arg0: i32) -> (i32, i32) {
    %c0_i32 = arith.constant 0 : i32
    %c0_i32_0 = arith.constant 0 : i32
    return %arg0, %c0_i32 : i32, i32
  }
  func.func @transform_2(%arg0: i32) -> (i32, i32) {
    %c0_i32 = arith.constant 0 : i32
    %c0_i32_0 = arith.constant 0 : i32
    return %arg0, %c0_i32 : i32, i32
  }
}

</mosaic_0001>

<bundles_post_ra>
// kernel: tpu_custom_call.1
= control target key start
LH: loop header
LB: loop body
LE: loop exit
PB: predicated region body
PF: predicated region fallthrough
CT: control target
= control target key end

     0   :  { %7 = vsyncpa [#allocation3], 0  ;;  %s291_s0 = inlined_call_operand.hbm [shape: f32[8,128], index: 0, kind: input, shape index: {}]   ;;  %s292_s1 = inlined_call_operand.hbm [shape: f32[8,128], index: 1, kind: input, shape index: {}]   ;;  %s293_s2 = inlined_call_operand.hbm [shape: f32[1,8], index: 2, kind: output, shape index: {}]  }
   0x1   :  { %8 = vsyncpa [#allocation6], 0 }
   0x2   :  { %9 = vsyncpa [#allocation4], 0  ;;  %s234_s9 = smov [#allocation2]   ;;  %s235_s11 = smov [#allocation5]  }
   0x3   :  { %s16_s10 = sshll.u32 %s234_s9, 4  ;;  %s26_s12 = sshll.u32 %s235_s11, 4  ;;  %s17_s10 = int_to_ptr.vmem [resolvable:$true] %s16_s10  ;;  %s27_s12 = int_to_ptr.vmem [resolvable:$true] %s26_s12 }
   0x4   :  { %s162_s15 = scalar_lea.hbm %s291_s0, 128 }
   0x5   :  { %p163_p0 = scmp.ne.s32.totalorder %s291_s0, %s162_s15  ;;  %p166_p1 = scmp.lt.u32.totalorder %s162_s15, %s291_s0 }
   0x7   :  { %p168_p2 = pnand %p166_p1, %p163_p0 }
   0x9   :  { %171 = shalt.err (!%p168_p2)
}
   0xa   :  { %s172_s20 = scalar_lea.vmem %s17_s10, 128  ;;  %p177_p4 = scmp.lt.s32.totalorder %s17_s10, %s17_s10 }
   0xb   :  { %p173_p3 = scmp.ne.s32.totalorder %s17_s10, %s172_s20  ;;  %p178_p5 = scmp.lt.s32.totalorder %s172_s20, %s172_s20 }
   0xd   :  { %p179_p6 = por %p178_p5, %p177_p4 }
   0xf   :  { %p180_p7 = pnand %p179_p6, %p173_p3 }
  0x11   :  { %183 = shalt.err (!%p180_p7)
}
  0x12   :  { %19 = dma.hbm_to_vmem [thread:$0]  %s291_s0, 128, %s17_s10, [#allocation3]  }
  0x13   :  { %s184_s25 = scalar_lea.hbm %s292_s1, 128 }
  0x14   :  { %p185_p8 = scmp.ne.s32.totalorder %s292_s1, %s184_s25  ;;  %p188_p9 = scmp.lt.u32.totalorder %s184_s25, %s292_s1 }
  0x16   :  { %p190_p10 = pnand %p188_p9, %p185_p8 }
  0x18   :  { %193 = shalt.err (!%p190_p10)
}
  0x19   :  { %s194_s30 = scalar_lea.vmem %s27_s12, 128  ;;  %p199_p12 = scmp.lt.s32.totalorder %s27_s12, %s27_s12 }
  0x1a   :  { %p195_p11 = scmp.ne.s32.totalorder %s27_s12, %s194_s30  ;;  %p200_p13 = scmp.lt.s32.totalorder %s194_s30, %s194_s30 }
  0x1c   :  { %p201_p0 = por %p200_p13, %p199_p12 }
  0x1e   :  { %p202_p1 = pnand %p201_p0, %p195_p11 }
  0x20   :  { %205 = shalt.err (!%p202_p1)
}
  0x21   :  { %29 = dma.hbm_to_vmem [thread:$0]  %s292_s1, 128, %s27_s12, [#allocation6]  }
  0x22   :  { %228 = dma.done.wait [#allocation3], 128  }
  0x23   :  { %229 = vsyncadd [#allocation3], 4294967168 }
  0x24   :  { %230 = dma.done.wait [#allocation6], 128  }
  0x25   :  { %231 = vsyncadd [#allocation6], 4294967168  ;;  %v236_v0 = vmov 0.0   ;;  %vm237_vm0 = vmmov 0   ;;  %v36_v1 = vld [vmem:[#allocation2] sm:$0xff]  ;;  %v37_v2 = vld [vmem:[#allocation5] sm:$0xff] }
  0x26   :  { %145 = vmatprep.subr.mxu0 %v236_v0  ;;  %147 = vmatprep.mubr.msk.f32.mxu0 %vm237_vm0, %v236_v0  ;;  %v38_v3 = vadd.f32 %v37_v2, %v36_v1  ;;  %v40_v4 = vadd.f32 1e-10, %v36_v1  ;;  %v44_v5 = vadd.f32 1e-10, %v37_v2  ;;  %v238_v19 = vmov 1.0   ;;  %s239_s1 = smov [#allocation7]  }
  0x27   :  { %s133_s4 = sshll.u32 %s239_s1, 4  ;;  %vm125_vm1 = vcmask 57344   ;;  %s134_s4 = int_to_ptr.vmem [resolvable:$true] %s133_s4 }
  0x28   :  { %v39_v6 = vmul.f32 0.5, %v38_v3  ;;  %156 = vlog2.f32 %v40_v4  ;;  %s206_s5 = scalar_lea.vmem %s134_s4, 16  ;;  %s210_s6 = scalar_lea.vmem %s134_s4, 32 }
  0x29   :  { %158 = vlog2.f32 %v44_v5  ;;  %p207_p2 = scmp.ne.s32.totalorder %s134_s4, %s206_s5  ;;  %p211_p3 = scmp.lt.s32.totalorder %s134_s4, %s134_s4 }
  0x2a   :  { %v49_v7 = vadd.f32 1e-10, %v39_v6  ;;  %p212_p4 = scmp.lt.s32.totalorder %s210_s6, %s206_s5 }
  0x2c   :  { %160 = vlog2.f32 %v49_v7  ;;  %p213_p5 = por %p212_p4, %p211_p3 }
  0x2e   :  { %p214_p6 = pnand %p213_p5, %p207_p2 }
  0x32   :  { %v157_v8 = vpop.eup %156 }
  0x33   :  { %v159_v9 = vpop.eup %158  ;;  %v42_v10 = vmul.f32 0.6931472, %v157_v8 }
  0x34   :  { %v46_v11 = vmul.f32 0.6931472, %v159_v9 }
  0x35   :  { %v43_v12 = vmul.f32 %v42_v10, %v36_v1 }
  0x36   :  { %v161_v13 = vpop.eup %160  ;;  %v47_v14 = vmul.f32 %v46_v11, %v37_v2 }
  0x37   :  { %v51_v15 = vmul.f32 0.6931472, %v161_v13 }
  0x38   :  { %v48_v16 = vadd.f32 %v47_v14, %v43_v12 }
  0x39   :  { %v52_v17 = vmul.f32 %v51_v15, %v38_v3 }
  0x3b   :  { %v53_v18 = vsub.f32 %v48_v16, %v52_v17 }
  0x3d   :  { %146 = vmatpush3.xpose.msra.mxu0 %v53_v18 }
  0x40   :  { %148 = vmatmul.mubr.f32.vlgmr.msra.gmra.mrb[0].mxu0 %v238_v19 }
 0x113   :  { %v120_v20 = vpop.f32.mrb[0].mxu0 }
 0x114   :  { %v124_v21 = vmul.f32 0.5, %v120_v20  ;;  %v149_v22 = vpop.f32.mrb[1].mxu0 }
 0x116   :  { %126 = vst.msk [vmem:[#allocation7] sm:$0x1] %vm125_vm1, %v124_v21 }
 0x117   :  { %217 = shalt.err (!%p214_p6)
}
 0x118   :  { %s218_s9 = scalar_lea.hbm %s293_s2, 16 }
 0x119   :  { %p219_p7 = scmp.ne.s32.totalorder %s293_s2, %s218_s9  ;;  %p222_p8 = scmp.lt.u32.totalorder %s218_s9, %s293_s2 }
 0x11b   :  { %p224_p9 = pnand %p222_p8, %p219_p7 }
 0x11d   :  { %227 = shalt.err (!%p224_p9)
}
 0x11e   :  { %136 = dma.vmem_to_hbm [thread:$0]  %s134_s4, 16, %s293_s2, [#allocation4]  }
 0x11f   :  { %232 = dma.done.wait [#allocation4], 16  }
 0x120   :  { %233 = vsyncadd [#allocation4], 4294967280 }
 0x121   :  { %140 = vsyncpa [#allocation3], 1 }
 0x122   :  { %141 = vsyncpa [#allocation6], 1 }
 0x123   :  { %142 = vsyncpa [#allocation4], 1 }

</bundles_post_ra>
